<compile_context>
chip_gen: v5e
topology: v5e:2x2
jax: 0.10.0
libtpu: 0.0.40
codegen_flags: <defaults>
</compile_context>

<pallas_src>
import jax
import jax.numpy as jnp
from jax.experimental import pallas as pl
from jax.experimental.pallas import tpu as pltpu

_LANE = 128


def _se_kernel(x_ref, w1_ref, b1_ref, w2_ref, b2_ref, o_ref, acc_ref):
    """One (batch-tile, spatial-chunk) grid step of the SE block.

    x_ref  : (tile_n, C, tile_hw)  streamed spatial chunk of the input
    w1_ref : (C, mid)   compress weight, pre-scaled by 1/(H*W)  (VMEM-resident)
    b1_ref : (1, mid)
    w2_ref : (mid, C)   excitation weight                       (VMEM-resident)
    b2_ref : (1, C)
    o_ref  : (tile_n, C)           sigmoid gate (written on last chunk only)
    acc_ref: (tile_n, C, 128) f32  lane-parallel partial-sum accumulator
    """
    k = pl.program_id(1)

    @pl.when(k == 0)
    def _init():
        acc_ref[...] = jnp.zeros_like(acc_ref)

    # ---- squeeze: accumulate this chunk's spatial sum ----------------------
    # Bulk of the reduction stays on the VPU: add lane-aligned 128-wide slices
    # elementwise; a single cross-lane (XLU) reduce happens at finalize.
    chunk = x_ref[...]
    nsub = chunk.shape[-1] // _LANE
    partial = chunk[..., 0:_LANE].astype(jnp.float32)
    for s in range(1, nsub):
        partial = partial + chunk[..., s * _LANE:(s + 1) * _LANE].astype(jnp.float32)
    acc_ref[...] += partial

    # ---- excite: tiny matmuls + sigmoid, once per batch tile ---------------
    @pl.when(k == pl.num_programs(1) - 1)
    def _finalize():
        pooled = jnp.sum(acc_ref[...], axis=-1)          # (tile_n, C) raw sum
        # 1/(H*W) is folded into w1 in the wrapper, so no divide is needed here.
        h = jnp.dot(pooled, w1_ref[...], preferred_element_type=jnp.float32)
        h = jnp.maximum(h + b1_ref[...], 0.0)
        out = jnp.dot(h, w2_ref[...], preferred_element_type=jnp.float32) + b2_ref[...]
        o_ref[...] = jax.nn.sigmoid(out).astype(o_ref.dtype)


def se_forward(x, w_compress, b_compress, w_excite, b_excite,
               *, tile_hw_target=2048, tile_n_target=8,
               x_stream_budget_bytes=24 * 1024 * 1024):
    """SE forward.

    x           : (N, C, H, W)
    w_compress  : (mid, C, 1, 1)  (PyTorch Conv2d weight layout)
    b_compress  : (mid,)
    w_excite    : (C, mid, 1, 1)
    b_excite    : (C,)
    returns     : (N, C, 1, 1) = sigmoid(excite(relu(compress(avgpool(x)))))
    """
    N, C, H, W = x.shape
    mid = w_compress.shape[0]
    HW = H * W
    itemsize = jnp.dtype(x.dtype).itemsize

    # ---- batch tiling -------------------------------------------------------
    if N <= tile_n_target:
        tile_n, n_pad = N, N
    else:
        tile_n = tile_n_target                       # multiple of 8 (sublane-friendly)
        n_pad = pl.cdiv(N, tile_n) * tile_n

    # ---- spatial chunking: large lane-aligned chunks sized against VMEM ----
    hw_lane = pl.cdiv(HW, _LANE) * _LANE
    max_hw_from_budget = x_stream_budget_bytes // max(1, 2 * tile_n * C * itemsize)
    tile_hw = min(tile_hw_target, hw_lane, max_hw_from_budget)
    tile_hw = max(_LANE, (tile_hw // _LANE) * _LANE)
    hw_pad = pl.cdiv(HW, tile_hw) * tile_hw

    # ---- host-side layout plumbing ------------------------------------------
    x_flat = x.reshape(N, C, HW)
    if n_pad != N or hw_pad != HW:
        # zero padding is exact for the sum; padded batch rows are sliced off.
        x_flat = jnp.pad(x_flat, ((0, n_pad - N), (0, 0), (0, hw_pad - HW)))

    # 1x1 convs -> dense matmuls (right-multiply). Fold the 1/(H*W) pooling
    # scale into w1 (compress conv is linear, so this is exact).
    w1 = (w_compress.reshape(mid, C).T).astype(jnp.float32) * jnp.float32(1.0 / HW)
    b1 = b_compress.reshape(1, mid).astype(jnp.float32)
    w2 = (w_excite.reshape(C, mid).T).astype(jnp.float32)
    b2 = b_excite.reshape(1, C).astype(jnp.float32)

    grid = (n_pad // tile_n, hw_pad // tile_hw)

    # VMEM sizing: double-buffered x chunks + resident weights + scratch + out.
    est_vmem = (2 * tile_n * C * tile_hw * itemsize
                + tile_n * C * _LANE * 4
                + 2 * (2 * C * mid + C + mid) * 4
                + 2 * tile_n * C * itemsize)
    vmem_limit = int(min(60 * 1024 * 1024,
                         max(32 * 1024 * 1024, est_vmem * 5 // 4)))

    cost = pl.CostEstimate(
        flops=int(n_pad * C * hw_pad + 4 * n_pad * C * mid),
        transcendentals=int(n_pad * C),
        bytes_accessed=int(n_pad * C * hw_pad * itemsize        # dominant: stream x
                           + n_pad * C * itemsize               # output gate
                           + (2 * C * mid + C + mid) * 4),      # weights
    )

    out = pl.pallas_call(
        _se_kernel,
        out_shape=jax.ShapeDtypeStruct((n_pad, C), x.dtype),
        grid=grid,
        in_specs=[
            pl.BlockSpec((tile_n, C, tile_hw), lambda i, k: (i, 0, k)),
            # weights/biases: constant block index -> stay resident in VMEM
            pl.BlockSpec((C, mid), lambda i, k: (0, 0)),
            pl.BlockSpec((1, mid), lambda i, k: (0, 0)),
            pl.BlockSpec((mid, C), lambda i, k: (0, 0)),
            pl.BlockSpec((1, C), lambda i, k: (0, 0)),
        ],
        out_specs=pl.BlockSpec((tile_n, C), lambda i, k: (i, 0)),
        scratch_shapes=[pltpu.VMEM((tile_n, C, _LANE), jnp.float32)],
        compiler_params=pltpu.CompilerParams(
            dimension_semantics=("parallel", "arbitrary"),
            vmem_limit_bytes=vmem_limit,
        ),
        cost_estimate=cost,
    )(x_flat, w1, b1, w2, b2)

    return out[:N].reshape(N, C, 1, 1)


def _reference(x, w_compress, b_compress, w_excite, b_excite):
    # pure-JAX reference for sanity check
    pooled = jnp.mean(x.astype(jnp.float32), axis=(2, 3))          # (N, C)
    mid = w_compress.shape[0]
    C = x.shape[1]
    h = pooled @ w_compress.reshape(mid, C).T + b_compress
    h = jnp.maximum(h, 0.0)
    o = h @ w_excite.reshape(C, mid).T + b_excite
    return jax.nn.sigmoid(o).reshape(x.shape[0], C, 1, 1).astype(x.dtype)


if __name__ == "__main__":
    keys = jax.random.split(jax.random.PRNGKey(0), 10)

    # --- shape 1: toy shape from the module spec -----------------------------
    N, C, H, W = 2, 4, 16, 16
    ratio = 2
    mid = C // ratio
    x = jax.random.normal(keys[0], (N, C, H, W), dtype=jnp.float32)
    w_compress = jax.random.normal(keys[1], (mid, C, 1, 1), dtype=jnp.float32) * 0.5
    b_compress = jax.random.normal(keys[2], (mid,), dtype=jnp.float32) * 0.1
    w_excite = jax.random.normal(keys[3], (C, mid, 1, 1), dtype=jnp.float32) * 0.5
    b_excite = jax.random.normal(keys[4], (C,), dtype=jnp.float32) * 0.1

    ref = _reference(x, w_compress, b_compress, w_excite, b_excite)

    out = jax.block_until_ready(
        se_forward(x, w_compress, b_compress, w_excite, b_excite))
    assert out.shape == (N, C, 1, 1), out.shape
    assert jnp.allclose(out, ref, atol=1e-5, rtol=1e-5), float(
        jnp.max(jnp.abs(out - ref)))

    # also exercise the multi-chunk accumulation path (2 HW chunks)
    out_chunked = jax.block_until_ready(
        se_forward(x, w_compress, b_compress, w_excite, b_excite,
                   tile_hw_target=128))
    assert jnp.allclose(out_chunked, ref, atol=1e-5, rtol=1e-5), float(
        jnp.max(jnp.abs(out_chunked - ref)))

    # --- shape 2: exercise batch tiling + batch/spatial zero-padding ---------
    N2, C2, H2, W2 = 9, 8, 12, 12          # HW=144 (ragged), N=9 > tile_n_target
    mid2 = C2 // ratio
    x2 = jax.random.normal(keys[5], (N2, C2, H2, W2), dtype=jnp.float32)
    w1_2 = jax.random.normal(keys[6], (mid2, C2, 1, 1), dtype=jnp.float32) * 0.5
    b1_2 = jax.random.normal(keys[7], (mid2,), dtype=jnp.float32) * 0.1
    w2_2 = jax.random.normal(keys[8], (C2, mid2, 1, 1), dtype=jnp.float32) * 0.5
    b2_2 = jax.random.normal(keys[9], (C2,), dtype=jnp.float32) * 0.1

    ref2 = _reference(x2, w1_2, b1_2, w2_2, b2_2)
    out2 = jax.block_until_ready(
        se_forward(x2, w1_2, b1_2, w2_2, b2_2, tile_hw_target=128))
    assert out2.shape == (N2, C2, 1, 1), out2.shape
    assert jnp.allclose(out2, ref2, atol=1e-5, rtol=1e-5), float(
        jnp.max(jnp.abs(out2 - ref2)))

    print("KERNEL_OK")
</pallas_src>

<mosaic_0001>
module attributes {stable_mosaic.version = 11 : i64} {
  func.func @_se_kernel(%arg0: i32, %arg1: i32, %arg2: memref<2x4x256xf32, #tpu.memory_space<vmem>>, %arg3: memref<4x2xf32, #tpu.memory_space<vmem>>, %arg4: memref<1x2xf32, #tpu.memory_space<vmem>>, %arg5: memref<2x4xf32, #tpu.memory_space<vmem>>, %arg6: memref<1x4xf32, #tpu.memory_space<vmem>>, %arg7: memref<2x4xf32, #tpu.memory_space<vmem>>, %arg8: memref<2x4x128xf32, #tpu.memory_space<vmem>>) attributes {dimension_semantics = [#tpu.dimension_semantics<parallel>, #tpu.dimension_semantics<arbitrary>], iteration_bounds = array<i64: 1, 1>, scalar_prefetch = 0 : i64, scratch_operands = 1 : i64, tpu.core_type = #tpu.core_type<tc>, window_params = [{transform_indices = @transform_0, window_bounds = array<i64: 2, 4, 256>}, {pipeline_mode = #tpu.pipeline_mode<synchronous>, transform_indices = @transform_1, window_bounds = array<i64: 4, 2>}, {pipeline_mode = #tpu.pipeline_mode<synchronous>, transform_indices = @transform_2, window_bounds = array<i64: 1, 2>}, {pipeline_mode = #tpu.pipeline_mode<synchronous>, transform_indices = @transform_3, window_bounds = array<i64: 2, 4>}, {pipeline_mode = #tpu.pipeline_mode<synchronous>, transform_indices = @transform_4, window_bounds = array<i64: 1, 4>}, {transform_indices = @transform_5, window_bounds = array<i64: 2, 4>}]} {
    %c0_i32 = arith.constant 0 : i32
    %0 = arith.cmpi eq, %arg1, %c0_i32 : i32
    %1 = arith.extui %0 : i1 to i32
    %c0_i32_0 = arith.constant 0 : i32
    %2 = arith.cmpi ne, %1, %c0_i32_0 : i32
    scf.if %2 {
      %cst = arith.constant 0.000000e+00 : f32
      %13 = vector.broadcast %cst : f32 to vector<2x4x128xf32>
      %c0_11 = arith.constant 0 : index
      %c0_12 = arith.constant 0 : index
      %c0_13 = arith.constant 0 : index
      %14 = vector.load %arg8[%c0_11, %c0_12, %c0_13] : memref<2x4x128xf32, #tpu.memory_space<vmem>>, vector<2x4x128xf32>
      tpu.vector_store %arg8[%c0_11, %c0_12, %c0_13], %13 {strides = array<i32>} : memref<2x4x128xf32, #tpu.memory_space<vmem>>, vector<2x4x128xf32>,
    } else {
    }
    %c0 = arith.constant 0 : index
    %c0_1 = arith.constant 0 : index
    %c0_2 = arith.constant 0 : index
    %3 = vector.load %arg2[%c0, %c0_1, %c0_2] : memref<2x4x256xf32, #tpu.memory_space<vmem>>, vector<2x4x256xf32>
    %4 = vector.extract_strided_slice %3 {offsets = [0, 0, 0], sizes = [2, 4, 128], strides = [1, 1, 1]} : vector<2x4x256xf32> to vector<2x4x128xf32>
    %5 = vector.extract_strided_slice %3 {offsets = [0, 0, 128], sizes = [2, 4, 128], strides = [1, 1, 1]} : vector<2x4x256xf32> to vector<2x4x128xf32>
    %6 = arith.addf %4, %5 : vector<2x4x128xf32>
    %c0_3 = arith.constant 0 : index
    %c0_4 = arith.constant 0 : index
    %c0_5 = arith.constant 0 : index
    %7 = vector.load %arg8[%c0_3, %c0_4, %c0_5] : memref<2x4x128xf32, #tpu.memory_space<vmem>>, vector<2x4x128xf32>
    %8 = arith.addf %7, %6 : vector<2x4x128xf32>
    %c0_6 = arith.constant 0 : index
    %c0_7 = arith.constant 0 : index
    %c0_8 = arith.constant 0 : index
    %9 = vector.load %arg8[%c0_6, %c0_7, %c0_8] : memref<2x4x128xf32, #tpu.memory_space<vmem>>, vector<2x4x128xf32>
    tpu.vector_store %arg8[%c0_6, %c0_7, %c0_8], %8 {strides = array<i32>} : memref<2x4x128xf32, #tpu.memory_space<vmem>>, vector<2x4x128xf32>,
    %c0_i32_9 = arith.constant 0 : i32
    %10 = arith.cmpi eq, %arg1, %c0_i32_9 : i32
    %11 = arith.extui %10 : i1 to i32
    %c0_i32_10 = arith.constant 0 : i32
    %12 = arith.cmpi ne, %11, %c0_i32_10 : i32
    scf.if %12 {
      %c0_11 = arith.constant 0 : index
      %c0_12 = arith.constant 0 : index
      %c0_13 = arith.constant 0 : index
      %13 = vector.load %arg8[%c0_11, %c0_12, %c0_13] : memref<2x4x128xf32, #tpu.memory_space<vmem>>, vector<2x4x128xf32>
      %cst = arith.constant dense<0.000000e+00> : vector<2x4xf32>
      %14 = vector.multi_reduction <add>, %13, %cst [2] : vector<2x4x128xf32> to vector<2x4xf32>
      %c0_14 = arith.constant 0 : index
      %c0_15 = arith.constant 0 : index
      %15 = vector.load %arg3[%c0_14, %c0_15] : memref<4x2xf32, #tpu.memory_space<vmem>>, vector<4x2xf32>
      %cst_16 = arith.constant dense<0.000000e+00> : vector<2x2xf32>
      %16 = tpu.matmul %14, %15, %cst_16 {dimension_numbers = #tpu.dot_dimension_numbers<[1], [0], [0], [1], [0, 0, 1, 1], [], []>} : vector<2x4xf32>, vector<4x2xf32>, vector<2x2xf32> -> vector<2x2xf32>
      %c0_17 = arith.constant 0 : index
      %c0_18 = arith.constant 0 : index
      %17 = vector.load %arg4[%c0_17, %c0_18] : memref<1x2xf32, #tpu.memory_space<vmem>>, vector<1x2xf32>
      %18 = vector.broadcast %17 : vector<1x2xf32> to vector<2x2xf32>
      %19 = arith.addf %16, %18 : vector<2x2xf32>
      %cst_19 = arith.constant 0.000000e+00 : f32
      %20 = vector.broadcast %cst_19 : f32 to vector<2x2xf32>
      %21 = arith.maximumf %19, %20 : vector<2x2xf32>
      %c0_20 = arith.constant 0 : index
      %c0_21 = arith.constant 0 : index
      %22 = vector.load %arg5[%c0_20, %c0_21] : memref<2x4xf32, #tpu.memory_space<vmem>>, vector<2x4xf32>
      %cst_22 = arith.constant dense<0.000000e+00> : vector<2x4xf32>
      %23 = tpu.matmul %21, %22, %cst_22 {dimension_numbers = #tpu.dot_dimension_numbers<[1], [0], [0], [1], [0, 0, 1, 1], [], []>} : vector<2x2xf32>, vector<2x4xf32>, vector<2x4xf32> -> vector<2x4xf32>
      %c0_23 = arith.constant 0 : index
      %c0_24 = arith.constant 0 : index
      %24 = vector.load %arg6[%c0_23, %c0_24] : memref<1x4xf32, #tpu.memory_space<vmem>>, vector<1x4xf32>
      %25 = vector.broadcast %24 : vector<1x4xf32> to vector<2x4xf32>
      %26 = arith.addf %23, %25 : vector<2x4xf32>
      %27 = arith.negf %26 : vector<2x4xf32>
      %28 = math.exp %27 : vector<2x4xf32>
      %cst_25 = arith.constant 1.000000e+00 : f32
      %29 = vector.broadcast %cst_25 : f32 to vector<2x4xf32>
      %30 = arith.addf %29, %28 : vector<2x4xf32>
      %31 = arith.divf %29, %30 : vector<2x4xf32>
      %c0_26 = arith.constant 0 : index
      %c0_27 = arith.constant 0 : index
      %32 = vector.load %arg7[%c0_26, %c0_27] : memref<2x4xf32, #tpu.memory_space<vmem>>, vector<2x4xf32>
      tpu.vector_store %arg7[%c0_26, %c0_27], %31 {strides = array<i32>} : memref<2x4xf32, #tpu.memory_space<vmem>>, vector<2x4xf32>,
    } else {
    }
    return
  }
  func.func @transform_0(%arg0: i32, %arg1: i32) -> (i32, i32, i32) {
    %c0_i32 = arith.constant 0 : i32
    %c0_i32_0 = arith.constant 0 : i32
    return %arg0, %c0_i32, %arg1 : i32, i32, i32
  }
  func.func @transform_1(%arg0: i32, %arg1: i32) -> (i32, i32) {
    %c0_i32 = arith.constant 0 : i32
    %c0_i32_0 = arith.constant 0 : i32
    %c0_i32_1 = arith.constant 0 : i32
    return %c0_i32, %c0_i32_0 : i32, i32
  }
  func.func @transform_2(%arg0: i32, %arg1: i32) -> (i32, i32) {
    %c0_i32 = arith.constant 0 : i32
    %c0_i32_0 = arith.constant 0 : i32
    %c0_i32_1 = arith.constant 0 : i32
    return %c0_i32, %c0_i32_0 : i32, i32
  }
  func.func @transform_3(%arg0: i32, %arg1: i32) -> (i32, i32) {
    %c0_i32 = arith.constant 0 : i32
    %c0_i32_0 = arith.constant 0 : i32
    %c0_i32_1 = arith.constant 0 : i32
    return %c0_i32, %c0_i32_0 : i32, i32
  }
  func.func @transform_4(%arg0: i32, %arg1: i32) -> (i32, i32) {
    %c0_i32 = arith.constant 0 : i32
    %c0_i32_0 = arith.constant 0 : i32
    %c0_i32_1 = arith.constant 0 : i32
    return %c0_i32, %c0_i32_0 : i32, i32
  }
  func.func @transform_5(%arg0: i32, %arg1: i32) -> (i32, i32) {
    %c0_i32 = arith.constant 0 : i32
    %c0_i32_0 = arith.constant 0 : i32
    return %arg0, %c0_i32 : i32, i32
  }
}

</mosaic_0001>

<bundles_post_ra>
// kernel: tpu_custom_call.1
= control target key start
LH: loop header
LB: loop body
LE: loop exit
PB: predicated region body
PF: predicated region fallthrough
CT: control target
= control target key end

     0   :  { %10 = vsyncpa [#allocation4], 0  ;;  %s303_s0 = inlined_call_operand.hbm [shape: f32[2,4,256], index: 0, kind: input, shape index: {}]   ;;  %s304_s1 = inlined_call_operand.vmem [shape: f32[4,2], index: 1, kind: input, shape index: {}]   ;;  %s305_s2 = inlined_call_operand.vmem [shape: f32[1,2], index: 2, kind: input, shape index: {}]   ;;  %s306_s3 = inlined_call_operand.vmem [shape: f32[2,4], index: 3, kind: input, shape index: {}]   ;;  %s307_s4 = inlined_call_operand.vmem [shape: f32[1,4], index: 4, kind: input, shape index: {}]   ;;  %s308_s5 = inlined_call_operand.hbm [shape: f32[2,4], index: 5, kind: output, shape index: {}]  }
   0x1   :  { %11 = vsyncpa [#allocation5], 0  ;;  %s16_s20 = sshll.u32 %s303_s0, 4  ;;  %s250_s21 = smov [#allocation3]   ;;  %s17_s20 = int_to_ptr.hbm [resolvable:$true] %s16_s20 }
   0x2   :  { %s18_s22 = sshll.u32 %s250_s21, 4  ;;  %s251_s23 = smov 128   ;;  %s19_s22 = int_to_ptr.vmem [resolvable:$true] %s18_s22 }
   0x3   :  { %s252_s24 = smov 8  }
   0x4   :  { %24 = dma.hbm_to_vmem [thread:$0]  %s17_s20, 256, %s19_s22, [#allocation4], %s251_s23, %s251_s23, %s252_s24  }
   0x5   :  { %246 = dma.done.wait [#allocation4], 256  }
   0x6   :  { %247 = vsyncadd [#allocation4], 4294967040  ;;  %v253_v0 = vmov 0.0   ;;  %v43_v1 = vld [vmem:[#allocation3] sm:$0xff]  ;;  %v44_v2 = vld [vmem:[#allocation3 + $0x8] sm:$0xff]  ;;  %vm64_vm0 = vcmask 1043456   ;;  %v78_v17 = vlaneseq }
   0x7   :  { %41 = vst [vmem:[#allocation2] sm:$0xf] %v253_v0  ;;  %v47_v3 = vrot.slane %v43_v1, 4  ;;  %v48_v4 = vrot.slane %v44_v2, 4  ;;  %v71_v15 = vld [vmem:[%s304_s1] sm:$0xf] }
   0x8   :  { %42 = vst [vmem:[#allocation2 + $0x4] sm:$0xf] %v253_v0  ;;  %182 = vmatpush.msk.msra.mxu0 %vm64_vm0, %v71_v15  ;;  %v79_v18 = vand.u32 127, %v78_v17  ;;  %vm82_vm1 = vcmask 1041409   ;;  %vm84_vm2 = vcmask 31744   ;;  %vm120_vm3 = vcmask 1041408  }
   0x9   :  { %v51_v7 = vadd.f32 %v47_v3, %v43_v1  ;;  %v52_v8 = vadd.f32 %v48_v4, %v44_v2  ;;  %v111_v23 = vld [vmem:[%s306_s3] sm:$0x3]  ;;  %vm116_vm4 = vcmask 15360   ;;  %vm163_vm8 = vcmask 25600  }
   0xa   :  { %184 = vmatpush.msk.msra.mxu1 %vm120_vm3, %v111_v23  ;;  %v192_v24 = vld [vmem:[%s305_s2] ss:$0 sm:$0xff]  ;;  %s254_s2 = smov [#allocation6]  }
   0xb   :  { %v193_v28 = vld [vmem:[%s307_s4] ss:$0 sm:$0xff]  ;;  %s170_s3 = sshll.u32 %s254_s2, 4  ;;  %s172_s4 = sshll.u32 %s308_s5, 4  ;;  %s171_s3 = int_to_ptr.vmem [resolvable:$true] %s170_s3  ;;  %s173_s4 = int_to_ptr.hbm [resolvable:$true] %s172_s4 }
   0xe   :  { %v53_v5 = vld [vmem:[#allocation2] sm:$0xf] }
   0xf   :  { %v54_v6 = vld [vmem:[#allocation2 + $0x4] sm:$0xf]  ;;  %v55_v9 = vadd.f32 %v53_v5, %v51_v7 }
  0x10   :  { %v56_v10 = vadd.f32 %v54_v6, %v52_v8 }
  0x11   :  { %57 = vst [vmem:[#allocation2] sm:$0xf] %v55_v9 }
  0x12   :  { %58 = vst [vmem:[#allocation2 + $0x4] sm:$0xf] %v56_v10 }
  0x18   :  { %v62_v11 = vld [vmem:[#allocation2] sm:$0xf] }
  0x19   :  { %v65_v12 = vsel %vm64_vm0, %v62_v11, 0.0  ;;  %v63_v13 = vld [vmem:[#allocation2 + $0x4] sm:$0xf] }
  0x1a   :  { %66 = vadd.xlane.f32.xlu0 %v65_v12  ;;  %v68_v14 = vsel %vm64_vm0, %v63_v13, 0.0 }
  0x22   :  { %69 = vadd.xlane.f32.xlu0 %v68_v14 }
  0x8d   :  { %v67_v16 = vpop.xlane.xlu0 %66 }
  0x8e   :  { %v80_v20 = vperm.slane %v67_v16, %v79_v18 }
  0x95   :  { %v70_v19 = vpop.xlane.xlu0 %69 }
  0x96   :  { %v81_v21 = vperm.slane %v70_v19, %v79_v18 }
  0x98   :  { %v83_v22 = vsel %vm82_vm1, %v81_v21, %v80_v20 }
  0x99   :  { %183 = vmatmul.msk.f32.vlgmr.msra.gmra.mxu0 %vm84_vm2, %v83_v22 }
 0x116   :  { %v107_v25 = vpop.f32.mrf.mxu0 }
 0x117   :  { %v108_v26 = vadd.f32 %v192_v24, %v107_v25 }
 0x119   :  { %v110_v27 = vmax.f32 %v108_v26, 0.0 }
 0x11b   :  { %185 = vmatmul.msk.f32.vlgmr.msra.gmra.mxu1 %vm116_vm4, %v110_v27 }
 0x198   :  { %v141_v29 = vpop.f32.mrf.mxu1 }
 0x199   :  { %v142_v30 = vadd.f32 %v193_v28, %v141_v29 }
 0x19b   :  { %v186_v31 = vmul.f32 -1.442695, %v142_v30 }
 0x19d   :  { %194 = vpow2.f32 %v186_v31 }
 0x1a3   :  { %v195_v32 = vpop.eup %194 }
 0x1a4   :  { %v147_v33 = vadd.f32 1.0, %v195_v32 }
 0x1a6   :  { %196 = vrcp.f32 %v147_v33  ;;  %v159_v37 = vand.u32 2147483648, %v147_v33  ;;  %v157_v39 = vand.u32 2147483647, %v147_v33  ;;  %vm153_vm6 = vweird.f32 %v147_v33 }
 0x1a8   :  { %v160_v41 = vor.u32 1.1754944e-38, %v159_v37  ;;  %vm158_vm9 = vcmp.eq.f32.partialorder %v157_v39, 8.507059e+37 }
 0x1ac   :  { %v197_v34 = vpop.eup %196 }
 0x1ad   :  { %v149_v35 = vmul.f32 %v197_v34, %v147_v33  ;;  %vm154_vm5 = vweird.f32 %v197_v34 }
 0x1ae   :  { %vm155_vm7 = vmor %vm153_vm6, %vm154_vm5 }
 0x1af   :  { %v150_v36 = vsub.f32 1.0, %v149_v35 }
 0x1b1   :  { %v151_v38 = vmul.f32 %v197_v34, %v150_v36 }
 0x1b3   :  { %v152_v40 = vadd.f32 %v197_v34, %v151_v38 }
 0x1b5   :  { %v156_v42 = vsel %vm155_vm7, %v197_v34, %v152_v40 }
 0x1b6   :  { %v161_v43 = vsel %vm158_vm9, %v160_v41, %v156_v42 }
 0x1b7   :  { %164 = vst.msk [vmem:[#allocation6] sm:$0x3] %vm163_vm8, %v161_v43 }
 0x1b8   :  { %175 = dma.vmem_to_hbm [thread:$0]  %s171_s3, 32, %s173_s4, [#allocation5]  }
 0x1b9   :  { %248 = dma.done.wait [#allocation5], 32  }
 0x1ba   :  { %249 = vsyncadd [#allocation5], 4294967264 }
 0x1bb   :  { %180 = vsyncpa [#allocation4], 1 }
 0x1bc   :  { %181 = vsyncpa [#allocation5], 1 }

</bundles_post_ra>
